<compile_context>
chip_gen: v5e
topology: v5e:2x2
jax: 0.10.0
libtpu: 0.0.40
codegen_flags: <defaults>
</compile_context>

<pallas_src>
import jax
import jax.numpy as jnp
from jax import lax
from jax.experimental import pallas as pl
from jax.experimental.pallas import tpu as pltpu

_LANES = 128
_SUBLANES = 8
# VMEM budget for the 3 double-buffered input streams (leaves headroom under
# the 32 MiB scoped limit we request, even on v7x's 64 MiB VMEM).
_INPUT_VMEM_BUDGET = 12 * 1024 * 1024
_VMEM_LIMIT_BYTES = 32 * 1024 * 1024


def _cdiv(a: int, b: int) -> int:
    return (a + b - 1) // b


def _round_up(x: int, m: int) -> int:
    return _cdiv(x, m) * m


def _softplus(x):
    # Numerically stable softplus: max(x, 0) + log1p(exp(-|x|)).
    return jnp.maximum(x, 0.0) + jnp.log1p(jnp.exp(-jnp.abs(x)))


def _pick_tile_rows(num_rows: int, row_bytes: int) -> int:
    """Largest multiple-of-8 row tile whose 3x double-buffered inputs fit."""
    budget = _INPUT_VMEM_BUDGET // (3 * 2 * max(row_bytes, 1))
    budget = max(_SUBLANES, (budget // _SUBLANES) * _SUBLANES)
    needed = _round_up(max(num_rows, 1), _SUBLANES)
    return min(budget, needed)


def _make_kernel(d: int, fold: int, total_rows: int, tile_rows: int):
    """Kernel over packed rows; each packed row holds `fold` original rows."""

    def kernel(a_ref, p_ref, n_ref, o_ref):
        i = pl.program_id(0)

        # Inputs may be bf16 in HBM; upcast once in VMEM/vregs.
        a = a_ref[...].astype(jnp.float32)   # (tile_rows, fold * d)
        p = p_ref[...].astype(jnp.float32)
        n = n_ref[...].astype(jnp.float32)

        # Lane-dense elementwise products on full vregs (VPU).
        ap = a * p
        an = a * n

        r = lax.broadcasted_iota(jnp.int32, (tile_rows, 1), 0)
        packed_row = i * tile_rows + r                     # (tile_rows, 1)

        acc = jnp.zeros((tile_rows, 1), jnp.float32)
        # `fold` is a small static constant (<= 16): unrolled at trace time.
        for c in range(fold):
            lo, hi = c * d, (c + 1) * d
            # 2-D (keepdims) reductions over each D-wide lane segment.
            pos = jnp.sum(ap[:, lo:hi], axis=1, keepdims=True)   # (tile_rows, 1)
            neg = jnp.sum(an[:, lo:hi], axis=1, keepdims=True)
            loss = _softplus(-pos) + _softplus(neg)
            # Mask rows that only exist because of wrapper padding.
            orig_row = packed_row * fold + c
            acc = acc + jnp.where(orig_row < total_rows, loss, 0.0)

        o_ref[...] = acc                                   # (tile_rows, 1)

    return kernel


def inner_product_loss(anchor, positive, negative):
    """Pallas TPU implementation of CFKG InnerProductLoss.forward."""
    B, D = anchor.shape
    assert positive.shape == (B, D) and negative.shape == (B, D)

    # Fold small embedding dims into a full 128-lane row when possible.
    if D <= _LANES and _LANES % D == 0 and (_LANES // D) <= 16:
        fold = _LANES // D
    else:
        fold = 1
    width = fold * D
    packed_rows = _cdiv(B, fold)

    # Tile selection: biggest batch tile that fits the VMEM budget (budgeted
    # at 4 B/elem so the same tile is safe for f32 inputs on every TPU gen).
    row_bytes = _round_up(width, _LANES) * 4
    tile_rows = _pick_tile_rows(packed_rows, row_bytes)
    packed_rows_pad = _round_up(packed_rows, tile_rows)
    num_tiles = packed_rows_pad // tile_rows
    pad_rows = packed_rows_pad * fold - B

    def pack(x):
        x = jnp.pad(x, ((0, pad_rows), (0, 0)))
        return x.reshape(packed_rows_pad, width)

    a, p, n = (pack(x) for x in (anchor, positive, negative))

    in_spec = pl.BlockSpec((tile_rows, width), lambda i: (i, 0))
    out_spec = pl.BlockSpec((tile_rows, 1), lambda i: (i, 0))

    itemsize = jnp.dtype(anchor.dtype).itemsize
    cost = pl.CostEstimate(
        flops=4 * B * D,
        transcendentals=4 * B,
        bytes_accessed=3 * packed_rows_pad * width * itemsize
        + 4 * packed_rows_pad,
    )

    per_packed_row = pl.pallas_call(
        _make_kernel(D, fold, B, tile_rows),
        out_shape=jax.ShapeDtypeStruct((packed_rows_pad, 1), jnp.float32),
        grid_spec=pltpu.PrefetchScalarGridSpec(
            num_scalar_prefetch=0,
            grid=(num_tiles,),
            in_specs=[in_spec, in_spec, in_spec],
            out_specs=out_spec,
        ),
        compiler_params=pltpu.CompilerParams(
            dimension_semantics=("parallel",),   # independent tiles -> megacore OK
            vmem_limit_bytes=_VMEM_LIMIT_BYTES,
        ),
        cost_estimate=cost,
    )(a, p, n)

    # Padded (masked) rows contribute exactly 0; finish the reduction in JAX.
    return jnp.sum(per_packed_row) / B


def _reference_loss(anchor, positive, negative):
    a = anchor.astype(jnp.float32)
    p = positive.astype(jnp.float32)
    n = negative.astype(jnp.float32)
    pos_score = jnp.sum(a * p, axis=1)
    neg_score = jnp.sum(a * n, axis=1)
    return jnp.mean(jax.nn.softplus(-pos_score) + jax.nn.softplus(neg_score))


if __name__ == "__main__":
    key = jax.random.PRNGKey(0)

    def check(B, D):
        k1, k2, k3 = jax.random.split(jax.random.fold_in(key, B * 1000 + D), 3)
        anchor = jax.random.normal(k1, (B, D), dtype=jnp.float32)
        positive = jax.random.normal(k2, (B, D), dtype=jnp.float32)
        negative = jax.random.normal(k3, (B, D), dtype=jnp.float32)

        loss = jax.block_until_ready(inner_product_loss(anchor, positive, negative))
        ref = jax.block_until_ready(_reference_loss(anchor, positive, negative))
        assert jnp.allclose(loss, ref, atol=1e-5, rtol=1e-5), (B, D, loss, ref)

    check(16, 32)   # lane-folded path (fold=4), spec-consistent small shape
    check(19, 32)   # ragged batch: exercises wrapper padding + in-kernel mask
    check(13, 96)   # D not dividing 128: unfolded path

    print("KERNEL_OK")
</pallas_src>

<mosaic_0001>
module attributes {stable_mosaic.version = 11 : i64} {
  func.func @kernel(%arg0: i32, %arg1: memref<8x128xf32, #tpu.memory_space<vmem>>, %arg2: memref<8x128xf32, #tpu.memory_space<vmem>>, %arg3: memref<8x128xf32, #tpu.memory_space<vmem>>, %arg4: memref<8x1xf32, #tpu.memory_space<vmem>>) attributes {dimension_semantics = [#tpu.dimension_semantics<parallel>], iteration_bounds = array<i64: 1>, scalar_prefetch = 0 : i64, scratch_operands = 0 : i64, tpu.core_type = #tpu.core_type<tc>, window_params = [{transform_indices = @transform_0, window_bounds = array<i64: 8, 128>}, {transform_indices = @transform_1, window_bounds = array<i64: 8, 128>}, {transform_indices = @transform_2, window_bounds = array<i64: 8, 128>}, {transform_indices = @transform_3, window_bounds = array<i64: 8, 1>}]} {
    %c0 = arith.constant 0 : index
    %c0_0 = arith.constant 0 : index
    %0 = vector.load %arg1[%c0, %c0_0] : memref<8x128xf32, #tpu.memory_space<vmem>>, vector<8x128xf32>
    %c0_1 = arith.constant 0 : index
    %c0_2 = arith.constant 0 : index
    %1 = vector.load %arg2[%c0_1, %c0_2] : memref<8x128xf32, #tpu.memory_space<vmem>>, vector<8x128xf32>
    %c0_3 = arith.constant 0 : index
    %c0_4 = arith.constant 0 : index
    %2 = vector.load %arg3[%c0_3, %c0_4] : memref<8x128xf32, #tpu.memory_space<vmem>>, vector<8x128xf32>
    %3 = arith.mulf %0, %1 : vector<8x128xf32>
    %4 = arith.mulf %0, %2 : vector<8x128xf32>
    %5 = tpu.iota {dimensions = array<i32: 0>} : vector<8x1xi32>
    %c8_i32 = arith.constant 8 : i32
    %6 = arith.muli %arg0, %c8_i32 : i32
    %7 = vector.broadcast %6 : i32 to vector<8x1xi32>
    %8 = arith.addi %7, %5 : vector<8x1xi32>
    %cst = arith.constant 0.000000e+00 : f32
    %9 = vector.broadcast %cst : f32 to vector<8x1xf32>
    %10 = vector.extract_strided_slice %3 {offsets = [0, 0], sizes = [8, 32], strides = [1, 1]} : vector<8x128xf32> to vector<8x32xf32>
    %cst_5 = arith.constant dense<0.000000e+00> : vector<8xf32>
    %11 = vector.multi_reduction <add>, %10, %cst_5 [1] : vector<8x32xf32> to vector<8xf32>
    %12 = vector.shape_cast %11 : vector<8xf32> to vector<8x1xf32>
    %13 = vector.extract_strided_slice %4 {offsets = [0, 0], sizes = [8, 32], strides = [1, 1]} : vector<8x128xf32> to vector<8x32xf32>
    %cst_6 = arith.constant dense<0.000000e+00> : vector<8xf32>
    %14 = vector.multi_reduction <add>, %13, %cst_6 [1] : vector<8x32xf32> to vector<8xf32>
    %15 = vector.shape_cast %14 : vector<8xf32> to vector<8x1xf32>
    %cst_7 = arith.constant 0.000000e+00 : f32
    %16 = vector.broadcast %cst_7 : f32 to vector<8x1xf32>
    %17 = arith.subf %16, %12 : vector<8x1xf32>
    %cst_8 = arith.constant 0.000000e+00 : f32
    %18 = vector.broadcast %cst_8 : f32 to vector<8x1xf32>
    %19 = arith.maximumf %17, %18 : vector<8x1xf32>
    %20 = math.absf %17 : vector<8x1xf32>
    %cst_9 = arith.constant 0.000000e+00 : f32
    %21 = vector.broadcast %cst_9 : f32 to vector<8x1xf32>
    %22 = arith.subf %21, %20 : vector<8x1xf32>
    %23 = math.exp %22 : vector<8x1xf32>
    %24 = math.log1p %23 : vector<8x1xf32>
    %25 = arith.addf %19, %24 : vector<8x1xf32>
    %cst_10 = arith.constant 0.000000e+00 : f32
    %26 = vector.broadcast %cst_10 : f32 to vector<8x1xf32>
    %27 = arith.maximumf %15, %26 : vector<8x1xf32>
    %28 = math.absf %15 : vector<8x1xf32>
    %cst_11 = arith.constant 0.000000e+00 : f32
    %29 = vector.broadcast %cst_11 : f32 to vector<8x1xf32>
    %30 = arith.subf %29, %28 : vector<8x1xf32>
    %31 = math.exp %30 : vector<8x1xf32>
    %32 = math.log1p %31 : vector<8x1xf32>
    %33 = arith.addf %27, %32 : vector<8x1xf32>
    %34 = arith.addf %25, %33 : vector<8x1xf32>
    %c4_i32 = arith.constant 4 : i32
    %35 = vector.broadcast %c4_i32 : i32 to vector<8x1xi32>
    %36 = arith.muli %8, %35 : vector<8x1xi32>
    %c0_i32 = arith.constant 0 : i32
    %37 = vector.broadcast %c0_i32 : i32 to vector<8x1xi32>
    %38 = arith.addi %36, %37 : vector<8x1xi32>
    %c16_i32 = arith.constant 16 : i32
    %39 = vector.broadcast %c16_i32 : i32 to vector<8x1xi32>
    %40 = arith.cmpi slt, %38, %39 : vector<8x1xi32>
    %cst_12 = arith.constant 0.000000e+00 : f32
    %41 = vector.broadcast %cst_12 : f32 to vector<8x1xf32>
    %42 = arith.select %40, %34, %41 : vector<8x1xi1>, vector<8x1xf32>
    %43 = arith.addf %9, %42 : vector<8x1xf32>
    %44 = vector.extract_strided_slice %3 {offsets = [0, 32], sizes = [8, 32], strides = [1, 1]} : vector<8x128xf32> to vector<8x32xf32>
    %cst_13 = arith.constant dense<0.000000e+00> : vector<8xf32>
    %45 = vector.multi_reduction <add>, %44, %cst_13 [1] : vector<8x32xf32> to vector<8xf32>
    %46 = vector.shape_cast %45 : vector<8xf32> to vector<8x1xf32>
    %47 = vector.extract_strided_slice %4 {offsets = [0, 32], sizes = [8, 32], strides = [1, 1]} : vector<8x128xf32> to vector<8x32xf32>
    %cst_14 = arith.constant dense<0.000000e+00> : vector<8xf32>
    %48 = vector.multi_reduction <add>, %47, %cst_14 [1] : vector<8x32xf32> to vector<8xf32>
    %49 = vector.shape_cast %48 : vector<8xf32> to vector<8x1xf32>
    %cst_15 = arith.constant 0.000000e+00 : f32
    %50 = vector.broadcast %cst_15 : f32 to vector<8x1xf32>
    %51 = arith.subf %50, %46 : vector<8x1xf32>
    %cst_16 = arith.constant 0.000000e+00 : f32
    %52 = vector.broadcast %cst_16 : f32 to vector<8x1xf32>
    %53 = arith.maximumf %51, %52 : vector<8x1xf32>
    %54 = math.absf %51 : vector<8x1xf32>
    %cst_17 = arith.constant 0.000000e+00 : f32
    %55 = vector.broadcast %cst_17 : f32 to vector<8x1xf32>
    %56 = arith.subf %55, %54 : vector<8x1xf32>
    %57 = math.exp %56 : vector<8x1xf32>
    %58 = math.log1p %57 : vector<8x1xf32>
    %59 = arith.addf %53, %58 : vector<8x1xf32>
    %cst_18 = arith.constant 0.000000e+00 : f32
    %60 = vector.broadcast %cst_18 : f32 to vector<8x1xf32>
    %61 = arith.maximumf %49, %60 : vector<8x1xf32>
    %62 = math.absf %49 : vector<8x1xf32>
    %cst_19 = arith.constant 0.000000e+00 : f32
    %63 = vector.broadcast %cst_19 : f32 to vector<8x1xf32>
    %64 = arith.subf %63, %62 : vector<8x1xf32>
    %65 = math.exp %64 : vector<8x1xf32>
    %66 = math.log1p %65 : vector<8x1xf32>
    %67 = arith.addf %61, %66 : vector<8x1xf32>
    %68 = arith.addf %59, %67 : vector<8x1xf32>
    %c4_i32_20 = arith.constant 4 : i32
    %69 = vector.broadcast %c4_i32_20 : i32 to vector<8x1xi32>
    %70 = arith.muli %8, %69 : vector<8x1xi32>
    %c1_i32 = arith.constant 1 : i32
    %71 = vector.broadcast %c1_i32 : i32 to vector<8x1xi32>
    %72 = arith.addi %70, %71 : vector<8x1xi32>
    %c16_i32_21 = arith.constant 16 : i32
    %73 = vector.broadcast %c16_i32_21 : i32 to vector<8x1xi32>
    %74 = arith.cmpi slt, %72, %73 : vector<8x1xi32>
    %cst_22 = arith.constant 0.000000e+00 : f32
    %75 = vector.broadcast %cst_22 : f32 to vector<8x1xf32>
    %76 = arith.select %74, %68, %75 : vector<8x1xi1>, vector<8x1xf32>
    %77 = arith.addf %43, %76 : vector<8x1xf32>
    %78 = vector.extract_strided_slice %3 {offsets = [0, 64], sizes = [8, 32], strides = [1, 1]} : vector<8x128xf32> to vector<8x32xf32>
    %cst_23 = arith.constant dense<0.000000e+00> : vector<8xf32>
    %79 = vector.multi_reduction <add>, %78, %cst_23 [1] : vector<8x32xf32> to vector<8xf32>
    %80 = vector.shape_cast %79 : vector<8xf32> to vector<8x1xf32>
    %81 = vector.extract_strided_slice %4 {offsets = [0, 64], sizes = [8, 32], strides = [1, 1]} : vector<8x128xf32> to vector<8x32xf32>
    %cst_24 = arith.constant dense<0.000000e+00> : vector<8xf32>
    %82 = vector.multi_reduction <add>, %81, %cst_24 [1] : vector<8x32xf32> to vector<8xf32>
    %83 = vector.shape_cast %82 : vector<8xf32> to vector<8x1xf32>
    %cst_25 = arith.constant 0.000000e+00 : f32
    %84 = vector.broadcast %cst_25 : f32 to vector<8x1xf32>
    %85 = arith.subf %84, %80 : vector<8x1xf32>
    %cst_26 = arith.constant 0.000000e+00 : f32
    %86 = vector.broadcast %cst_26 : f32 to vector<8x1xf32>
    %87 = arith.maximumf %85, %86 : vector<8x1xf32>
    %88 = math.absf %85 : vector<8x1xf32>
    %cst_27 = arith.constant 0.000000e+00 : f32
    %89 = vector.broadcast %cst_27 : f32 to vector<8x1xf32>
    %90 = arith.subf %89, %88 : vector<8x1xf32>
    %91 = math.exp %90 : vector<8x1xf32>
    %92 = math.log1p %91 : vector<8x1xf32>
    %93 = arith.addf %87, %92 : vector<8x1xf32>
    %cst_28 = arith.constant 0.000000e+00 : f32
    %94 = vector.broadcast %cst_28 : f32 to vector<8x1xf32>
    %95 = arith.maximumf %83, %94 : vector<8x1xf32>
    %96 = math.absf %83 : vector<8x1xf32>
    %cst_29 = arith.constant 0.000000e+00 : f32
    %97 = vector.broadcast %cst_29 : f32 to vector<8x1xf32>
    %98 = arith.subf %97, %96 : vector<8x1xf32>
    %99 = math.exp %98 : vector<8x1xf32>
    %100 = math.log1p %99 : vector<8x1xf32>
    %101 = arith.addf %95, %100 : vector<8x1xf32>
    %102 = arith.addf %93, %101 : vector<8x1xf32>
    %c4_i32_30 = arith.constant 4 : i32
    %103 = vector.broadcast %c4_i32_30 : i32 to vector<8x1xi32>
    %104 = arith.muli %8, %103 : vector<8x1xi32>
    %c2_i32 = arith.constant 2 : i32
    %105 = vector.broadcast %c2_i32 : i32 to vector<8x1xi32>
    %106 = arith.addi %104, %105 : vector<8x1xi32>
    %c16_i32_31 = arith.constant 16 : i32
    %107 = vector.broadcast %c16_i32_31 : i32 to vector<8x1xi32>
    %108 = arith.cmpi slt, %106, %107 : vector<8x1xi32>
    %cst_32 = arith.constant 0.000000e+00 : f32
    %109 = vector.broadcast %cst_32 : f32 to vector<8x1xf32>
    %110 = arith.select %108, %102, %109 : vector<8x1xi1>, vector<8x1xf32>
    %111 = arith.addf %77, %110 : vector<8x1xf32>
    %112 = vector.extract_strided_slice %3 {offsets = [0, 96], sizes = [8, 32], strides = [1, 1]} : vector<8x128xf32> to vector<8x32xf32>
    %cst_33 = arith.constant dense<0.000000e+00> : vector<8xf32>
    %113 = vector.multi_reduction <add>, %112, %cst_33 [1] : vector<8x32xf32> to vector<8xf32>
    %114 = vector.shape_cast %113 : vector<8xf32> to vector<8x1xf32>
    %115 = vector.extract_strided_slice %4 {offsets = [0, 96], sizes = [8, 32], strides = [1, 1]} : vector<8x128xf32> to vector<8x32xf32>
    %cst_34 = arith.constant dense<0.000000e+00> : vector<8xf32>
    %116 = vector.multi_reduction <add>, %115, %cst_34 [1] : vector<8x32xf32> to vector<8xf32>
    %117 = vector.shape_cast %116 : vector<8xf32> to vector<8x1xf32>
    %cst_35 = arith.constant 0.000000e+00 : f32
    %118 = vector.broadcast %cst_35 : f32 to vector<8x1xf32>
    %119 = arith.subf %118, %114 : vector<8x1xf32>
    %cst_36 = arith.constant 0.000000e+00 : f32
    %120 = vector.broadcast %cst_36 : f32 to vector<8x1xf32>
    %121 = arith.maximumf %119, %120 : vector<8x1xf32>
    %122 = math.absf %119 : vector<8x1xf32>
    %cst_37 = arith.constant 0.000000e+00 : f32
    %123 = vector.broadcast %cst_37 : f32 to vector<8x1xf32>
    %124 = arith.subf %123, %122 : vector<8x1xf32>
    %125 = math.exp %124 : vector<8x1xf32>
    %126 = math.log1p %125 : vector<8x1xf32>
    %127 = arith.addf %121, %126 : vector<8x1xf32>
    %cst_38 = arith.constant 0.000000e+00 : f32
    %128 = vector.broadcast %cst_38 : f32 to vector<8x1xf32>
    %129 = arith.maximumf %117, %128 : vector<8x1xf32>
    %130 = math.absf %117 : vector<8x1xf32>
    %cst_39 = arith.constant 0.000000e+00 : f32
    %131 = vector.broadcast %cst_39 : f32 to vector<8x1xf32>
    %132 = arith.subf %131, %130 : vector<8x1xf32>
    %133 = math.exp %132 : vector<8x1xf32>
    %134 = math.log1p %133 : vector<8x1xf32>
    %135 = arith.addf %129, %134 : vector<8x1xf32>
    %136 = arith.addf %127, %135 : vector<8x1xf32>
    %c4_i32_40 = arith.constant 4 : i32
    %137 = vector.broadcast %c4_i32_40 : i32 to vector<8x1xi32>
    %138 = arith.muli %8, %137 : vector<8x1xi32>
    %c3_i32 = arith.constant 3 : i32
    %139 = vector.broadcast %c3_i32 : i32 to vector<8x1xi32>
    %140 = arith.addi %138, %139 : vector<8x1xi32>
    %c16_i32_41 = arith.constant 16 : i32
    %141 = vector.broadcast %c16_i32_41 : i32 to vector<8x1xi32>
    %142 = arith.cmpi slt, %140, %141 : vector<8x1xi32>
    %cst_42 = arith.constant 0.000000e+00 : f32
    %143 = vector.broadcast %cst_42 : f32 to vector<8x1xf32>
    %144 = arith.select %142, %136, %143 : vector<8x1xi1>, vector<8x1xf32>
    %145 = arith.addf %111, %144 : vector<8x1xf32>
    %c0_43 = arith.constant 0 : index
    %c0_44 = arith.constant 0 : index
    %146 = vector.load %arg4[%c0_43, %c0_44] : memref<8x1xf32, #tpu.memory_space<vmem>>, vector<8x1xf32>
    tpu.vector_store %arg4[%c0_43, %c0_44], %145 {strides = array<i32>} : memref<8x1xf32, #tpu.memory_space<vmem>>, vector<8x1xf32>,
    return
  }
  func.func @transform_0(%arg0: i32) -> (i32, i32) {
    %c0_i32 = arith.constant 0 : i32
    %c0_i32_0 = arith.constant 0 : i32
    return %arg0, %c0_i32 : i32, i32
  }
  func.func @transform_1(%arg0: i32) -> (i32, i32) {
    %c0_i32 = arith.constant 0 : i32
    %c0_i32_0 = arith.constant 0 : i32
    return %arg0, %c0_i32 : i32, i32
  }
  func.func @transform_2(%arg0: i32) -> (i32, i32) {
    %c0_i32 = arith.constant 0 : i32
    %c0_i32_0 = arith.constant 0 : i32
    return %arg0, %c0_i32 : i32, i32
  }
  func.func @transform_3(%arg0: i32) -> (i32, i32) {
    %c0_i32 = arith.constant 0 : i32
    %c0_i32_0 = arith.constant 0 : i32
    return %arg0, %c0_i32 : i32, i32
  }
}

</mosaic_0001>

<bundles_post_ra>
// kernel: tpu_custom_call.1
= control target key start
LH: loop header
LB: loop body
LE: loop exit
PB: predicated region body
PF: predicated region fallthrough
CT: control target
= control target key end

     0   :  { %8 = vsyncpa [#allocation3], 0  ;;  %s482_s0 = inlined_call_operand.hbm [shape: f32[8,128], index: 0, kind: input, shape index: {}]   ;;  %s483_s1 = inlined_call_operand.hbm [shape: f32[8,128], index: 1, kind: input, shape index: {}]   ;;  %s484_s2 = inlined_call_operand.hbm [shape: f32[8,128], index: 2, kind: input, shape index: {}]   ;;  %s485_s3 = inlined_call_operand.vmem [shape: f32[8,1], index: 3, kind: output, shape index: {}]  }
   0x1   :  { %9 = vsyncpa [#allocation5], 0  ;;  %s26_s14 = sshll.u32 %s483_s1, 4  ;;  %s376_s15 = smov [#allocation4]   ;;  %s27_s14 = int_to_ptr.hbm [resolvable:$true] %s26_s14 }
   0x2   :  { %s28_s16 = sshll.u32 %s376_s15, 4  ;;  %s15_s19 = sshll.u32 %s482_s0, 4  ;;  %s29_s16 = int_to_ptr.vmem [resolvable:$true] %s28_s16  ;;  %s16_s19 = int_to_ptr.hbm [resolvable:$true] %s15_s19 }
   0x3   :  { %31 = dma.hbm_to_vmem [thread:$0]  %s27_s14, 128, %s29_s16, [#allocation5]  }
   0x4   :  { %s377_s20 = smov [#allocation2]   ;;  %s37_s24 = sshll.u32 %s484_s2, 4  ;;  %s38_s24 = int_to_ptr.hbm [resolvable:$true] %s37_s24 }
   0x5   :  { %s17_s21 = sshll.u32 %s377_s20, 4  ;;  %s378_s1 = smov [#allocation6]   ;;  %s18_s21 = int_to_ptr.vmem [resolvable:$true] %s17_s21 }
   0x6   :  { %20 = dma.hbm_to_vmem [thread:$0]  %s16_s19, 128, %s18_s21, [#allocation3]  }
   0x7   :  { %s39_s25 = sshll.u32 %s378_s1, 4  ;;  %s40_s25 = int_to_ptr.vmem [resolvable:$true] %s39_s25 }
   0x8   :  { %42 = dma.hbm_to_vmem [thread:$0]  %s38_s24, 128, %s40_s25, [#allocation5]  }
   0x9   :  { %372 = dma.done.wait [#allocation3], 128  }
   0xa   :  { %373 = vsyncadd [#allocation3], 4294967168 }
   0xb   :  { %374 = dma.done.wait [#allocation5], 256  }
   0xc   :  { %375 = vsyncadd [#allocation5], 4294967040  ;;  %v55_v0 = vld [vmem:[#allocation2] sm:$0xff]  ;;  %v56_v1 = vld [vmem:[#allocation4] sm:$0xff]  ;;  %vm65_vm0 = vcmask 261120   ;;  %s379_s0 = smov 96  }
   0xd   :  { %v57_v2 = vld [vmem:[#allocation6] sm:$0xff]  ;;  %v58_v3 = vmul.f32 %v56_v1, %v55_v0  ;;  %s380_s2 = smov 64   ;;  %s381_s26 = smov 32   ;;  %vm254_vm13 = vcmask 7168  }
   0xe   :  { %v59_v4 = vmul.f32 %v57_v2, %v55_v0 }
   0xf   :  { %109 = vrot.lane.b32.xlu1 %v58_v3, %s379_s0  ;;  %v66_v5 = vsel %vm65_vm0, %v58_v3, 0.0 }
  0x10   :  { %116 = vrot.lane.b32.xlu2 %v59_v4, %s379_s0  ;;  %67 = vadd.xlane.f32.xlu0 %v66_v5  ;;  %v69_v6 = vsel %vm65_vm0, %v59_v4, 0.0 }
  0x18   :  { %158 = vrot.lane.b32.xlu2 %v58_v3, %s380_s2  ;;  %70 = vadd.xlane.f32.xlu0 %v69_v6 }
  0x20   :  { %206 = vrot.lane.b32.xlu2 %v58_v3, %s381_s26 }
  0x28   :  { %212 = vrot.lane.b32.xlu2 %v59_v4, %s381_s26 }
  0x2c   :  { %164 = vrot.lane.b32.xlu0 %v59_v4, %s380_s2 }
  0x6a   :  { %v117_v7 = vpop.permute.xlu2 %116 }
  0x6b   :  { %v119_v8 = vsel %vm65_vm0, %v117_v7, 0.0 }
  0x6c   :  { %120 = vadd.xlane.f32.xlu2 %v119_v8 }
  0x72   :  { %v159_v9 = vpop.permute.xlu2 %158 }
  0x73   :  { %v161_v10 = vsel %vm65_vm0, %v159_v9, 0.0 }
  0x74   :  { %162 = vadd.xlane.f32.xlu0 %v161_v10 }
  0x7a   :  { %v207_v37 = vpop.permute.xlu2 %206 }
  0x7b   :  { %v209_v47 = vsel %vm65_vm0, %v207_v37, 0.0 }
  0x81   :  { %v110_v11 = vpop.permute.xlu1 %109 }
  0x82   :  { %v112_v12 = vsel %vm65_vm0, %v110_v11, 0.0  ;;  %v213_v49 = vpop.permute.xlu2 %212 }
  0x83   :  { %113 = vadd.xlane.f32.xlu1 %v112_v12  ;;  %v68_v13 = vpop.xlane.xlu0 %67  ;;  %v215_v50 = vsel %vm65_vm0, %v213_v49, 0.0 }
  0x84   :  { %v72_v14 = vsub.f32 0.0, %v68_v13 }
  0x86   :  { %v74_v15 = vand.u32 2147483647, %v72_v14  ;;  %v73_v42 = vmax.f32 %v72_v14, 0.0 }
  0x88   :  { %v75_v16 = vsub.f32 0.0, %v74_v15 }
  0x8a   :  { %v76_v17 = vmul.f32 1.442695, %v75_v16 }
  0x8b   :  { %v71_v18 = vpop.xlane.xlu0 %70 }
  0x8c   :  { %268 = vpow2.f32 %v76_v17  ;;  %v89_v19 = vand.u32 2147483647, %v71_v18  ;;  %v88_v43 = vmax.f32 %v71_v18, 0.0 }
  0x8e   :  { %v90_v20 = vsub.f32 0.0, %v89_v19 }
  0x90   :  { %v91_v21 = vmul.f32 1.442695, %v90_v20 }
  0x92   :  { %v269_v22 = vpop.eup %268  ;;  %270 = vpow2.f32 %v91_v21 }
  0x93   :  { %v78_v23 = vadd.f32 1.0, %v269_v22  ;;  %v81_v25 = vmul.f32 -0.5, %v269_v22  ;;  %v84_v30 = vand.u32 2147483647, %v269_v22 }
  0x95   :  { %272 = vlog2.f32 %v78_v23  ;;  %v82_v29 = vadd.f32 1.0, %v81_v25  ;;  %vm85_vm1 = vcmp.lt.f32.partialorder %v84_v30, 0.0004427343 }
  0x97   :  { %v83_v36 = vmul.f32 %v269_v22, %v82_v29 }
  0x98   :  { %v271_v24 = vpop.eup %270 }
  0x99   :  { %v93_v26 = vadd.f32 1.0, %v271_v24  ;;  %v96_v27 = vmul.f32 -0.5, %v271_v24  ;;  %v99_v34 = vand.u32 2147483647, %v271_v24 }
  0x9b   :  { %v273_v28 = vpop.eup %272  ;;  %274 = vlog2.f32 %v93_v26  ;;  %v97_v32 = vadd.f32 1.0, %v96_v27  ;;  %vm100_vm2 = vcmp.lt.f32.partialorder %v99_v34, 0.0004427343 }
  0x9c   :  { %v80_v31 = vmul.f32 0.6931472, %v273_v28 }
  0x9d   :  { %v98_v41 = vmul.f32 %v271_v24, %v97_v32 }
  0x9e   :  { %v165_v33 = vpop.permute.xlu0 %164  ;;  %v86_v39 = vsel %vm85_vm1, %v83_v36, %v80_v31  ;;  %v60_v31 = vlaneseq }
  0x9f   :  { %v167_v35 = vsel %vm65_vm0, %v165_v33, 0.0  ;;  %v87_v45 = vadd.f32 %v86_v39, %v73_v42 }
  0xa0   :  { %168 = vadd.xlane.f32.xlu1 %v167_v35 }
  0xa1   :  { %v275_v38 = vpop.eup %274 }
  0xa2   :  { %v95_v40 = vmul.f32 0.6931472, %v275_v38 }
  0xa4   :  { %v101_v44 = vsel %vm100_vm2, %v98_v41, %v95_v40 }
  0xa5   :  { %v102_v46 = vadd.f32 %v101_v44, %v88_v43  ;;  %v61_v44 = vshrl.u32 %v60_v31, 7 }
  0xa7   :  { %v418_v48 = vadd.f32 %v102_v46, %v87_v45 }
  0xa8   :  { %210 = vadd.xlane.f32.xlu1 %v209_v47 }
  0xb0   :  { %216 = vadd.xlane.f32.xlu1 %v215_v50 }
  0xdf   :  { %v423_v52 = vpop.xlane.xlu2 %120 }
  0xe0   :  { %v139_v55 = vand.u32 2147483647, %v423_v52  ;;  %v138_v49 = vmax.f32 %v423_v52, 0.0 }
  0xe2   :  { %v140_v58 = vsub.f32 0.0, %v139_v55 }
  0xe4   :  { %v141_v61 = vmul.f32 1.442695, %v140_v58 }
  0xe6   :  { %276 = vpow2.f32 %v141_v61 }
  0xe7   :  { %v426_v54 = vpop.xlane.xlu0 %162 }
  0xe8   :  { %v170_v56 = vsub.f32 0.0, %v426_v54 }
  0xea   :  { %v172_v59 = vand.u32 2147483647, %v170_v56 }
  0xec   :  { %v173_v62 = vsub.f32 0.0, %v172_v59  ;;  %v277_v5 = vpop.eup %276 }
  0xed   :  { %v143_v9 = vadd.f32 1.0, %v277_v5  ;;  %v146_v21 = vmul.f32 -0.5, %v277_v5  ;;  %v149_v34 = vand.u32 2147483647, %v277_v5 }
  0xee   :  { %v174_v2 = vmul.f32 1.442695, %v173_v62 }
  0xef   :  { %v147_v32 = vadd.f32 1.0, %v146_v21  ;;  %vm450_vm4 = vcmp.lt.f32.partialorder %v149_v34, 0.0004427343 }
  0xf1   :  { %v148_v46 = vmul.f32 %v277_v5, %v147_v32 }
  0xf6   :  { %v421_v51 = vpop.xlane.xlu1 %113 }
  0xf7   :  { %v122_v53 = vsub.f32 0.0, %v421_v51 }
  0xf9   :  { %v124_v57 = vand.u32 2147483647, %v122_v53  ;;  %v123_v62 = vmax.f32 %v122_v53, 0.0  ;;  %v171_v53 = vmax.f32 %v170_v56, 0.0 }
  0xfb   :  { %v125_v60 = vsub.f32 0.0, %v124_v57 }
  0xfd   :  { %v126_v63 = vmul.f32 1.442695, %v125_v60 }
  0xff   :  { %278 = vpow2.f32 %v126_v63 }
 0x100   :  { %280 = vpow2.f32 %v174_v2  ;;  %v104_v2 = vmul.u32 4, %v61_v44 }
 0x102   :  { %vm105_vm8 = vcmp.lt.s32.totalorder %v104_v2, 16 }
 0x103   :  { %v106_v32 = vsel %vm105_vm8, %v418_v48, 0.0 }
 0x105   :  { %v279_v7 = vpop.eup %278 }
 0x106   :  { %v281_v11 = vpop.eup %280  ;;  %v128_v12 = vadd.f32 1.0, %v279_v7  ;;  %v131_v19 = vmul.f32 -0.5, %v279_v7  ;;  %v134_v29 = vand.u32 2147483647, %v279_v7 }
 0x107   :  { %v176_v17 = vadd.f32 1.0, %v281_v11  ;;  %v179_v23 = vmul.f32 -0.5, %v281_v11  ;;  %v182_v42 = vand.u32 2147483647, %v281_v11 }
 0x108   :  { %v132_v25 = vadd.f32 1.0, %v131_v19  ;;  %vm445_vm3 = vcmp.lt.f32.partialorder %v134_v29, 0.0004427343 }
 0x109   :  { %v180_v35 = vadd.f32 1.0, %v179_v23  ;;  %vm458_vm5 = vcmp.lt.f32.partialorder %v182_v42, 0.0004427343 }
 0x10a   :  { %v133_v38 = vmul.f32 %v279_v7, %v132_v25 }
 0x10b   :  { %v181_v55 = vmul.f32 %v281_v11, %v180_v35 }
 0x113   :  { %v434_v0 = vpop.xlane.xlu1 %168 }
 0x114   :  { %v187_v1 = vand.u32 2147483647, %v434_v0 }
 0x116   :  { %v188_v3 = vsub.f32 0.0, %v187_v1 }
 0x118   :  { %v189_v4 = vmul.f32 1.442695, %v188_v3 }
 0x11a   :  { %282 = vpow2.f32 %v189_v4 }
 0x11b   :  { %v437_v6 = vpop.xlane.xlu1 %210  ;;  %284 = vlog2.f32 %v143_v9  ;;  %v186_v9 = vmax.f32 %v434_v0, 0.0 }
 0x11c   :  { %v218_v8 = vsub.f32 0.0, %v437_v6  ;;  %286 = vlog2.f32 %v128_v12 }
 0x11e   :  { %v220_v10 = vand.u32 2147483647, %v218_v8 }
 0x120   :  { %v283_v13 = vpop.eup %282  ;;  %v221_v14 = vsub.f32 0.0, %v220_v10  ;;  %v154_v10 = vadd.s32 1, %v104_v2 }
 0x121   :  { %v191_v15 = vadd.f32 1.0, %v283_v13  ;;  %v285_v24 = vpop.eup %284  ;;  %v194_v26 = vmul.f32 -0.5, %v283_v13  ;;  %v197_v43 = vand.u32 2147483647, %v283_v13 }
 0x122   :  { %v222_v16 = vmul.f32 1.442695, %v221_v14  ;;  %v287_v28 = vpop.eup %286  ;;  %v145_v45 = vmul.f32 0.6931472, %v285_v24  ;;  %v202_v14 = vadd.s32 2, %v104_v2  ;;  %vm155_vm7 = vcmp.lt.s32.totalorder %v154_v10, 16 }
 0x123   :  { %v442_v18 = vpop.xlane.xlu1 %216  ;;  %v130_v37 = vmul.f32 0.6931472, %v287_v28  ;;  %v195_v39 = vadd.f32 1.0, %v194_v26  ;;  %vm462_vm6 = vcmp.lt.f32.partialorder %v197_v43, 0.0004427343  ;;  %v250_v24 = vadd.s32 3, %v104_v2 }
 0x124   :  { %288 = vpow2.f32 %v222_v16  ;;  %v235_v20 = vand.u32 2147483647, %v442_v18  ;;  %v151_v3 = vsel %vm450_vm4, %v148_v46, %v145_v45  ;;  %vm203_vm9 = vcmp.lt.s32.totalorder %v202_v14, 16 }
 0x125   :  { %290 = vlog2.f32 %v191_v15  ;;  %v136_v58 = vsel %vm445_vm3, %v133_v38, %v130_v37  ;;  %v196_v60 = vmul.f32 %v283_v13, %v195_v39  ;;  %v152_v13 = vadd.f32 %v151_v3, %v138_v49 }
 0x126   :  { %v236_v22 = vsub.f32 0.0, %v235_v20  ;;  %292 = vlog2.f32 %v176_v17  ;;  %v137_v51 = vadd.f32 %v136_v58, %v123_v62  ;;  %v219_v28 = vmax.f32 %v218_v8, 0.0 }
 0x127   :  { %v234_v29 = vmax.f32 %v442_v18, 0.0  ;;  %vm251_vm12 = vcmp.lt.s32.totalorder %v250_v24, 16 }
 0x128   :  { %v237_v27 = vmul.f32 1.442695, %v236_v22  ;;  %v153_v20 = vadd.f32 %v152_v13, %v137_v51 }
 0x12a   :  { %v289_v30 = vpop.eup %288  ;;  %294 = vpow2.f32 %v237_v27  ;;  %v156_v27 = vsel %vm155_vm7, %v153_v20, 0.0 }
 0x12b   :  { %v291_v33 = vpop.eup %290  ;;  %v224_v36 = vadd.f32 1.0, %v289_v30  ;;  %v227_v61 = vmul.f32 -0.5, %v289_v30  ;;  %v230_v16 = vand.u32 2147483647, %v289_v30  ;;  %v157_v35 = vadd.f32 %v156_v27, %v106_v32 }
 0x12c   :  { %v293_v40 = vpop.eup %292  ;;  %v193_v47 = vmul.f32 0.6931472, %v291_v33 }
 0x12d   :  { %296 = vlog2.f32 %v224_v36  ;;  %v178_v59 = vmul.f32 0.6931472, %v293_v40  ;;  %v228_v12 = vadd.f32 1.0, %v227_v61  ;;  %vm231_vm10 = vcmp.lt.f32.partialorder %v230_v16, 0.0004427343 }
 0x12e   :  { %v199_v4 = vsel %vm462_vm6, %v196_v60, %v193_v47 }
 0x12f   :  { %v184_v11 = vsel %vm458_vm5, %v181_v55, %v178_v59  ;;  %v200_v15 = vadd.f32 %v199_v4, %v186_v9  ;;  %v229_v54 = vmul.f32 %v289_v30, %v228_v12 }
 0x130   :  { %v295_v57 = vpop.eup %294  ;;  %v185_v21 = vadd.f32 %v184_v11, %v171_v53 }
 0x131   :  { %v239_v1 = vadd.f32 1.0, %v295_v57  ;;  %v242_v5 = vmul.f32 -0.5, %v295_v57  ;;  %v245_v22 = vand.u32 2147483647, %v295_v57 }
 0x132   :  { %v201_v0 = vadd.f32 %v200_v15, %v185_v21 }
 0x133   :  { %v297_v7 = vpop.eup %296  ;;  %298 = vlog2.f32 %v239_v1  ;;  %v243_v19 = vadd.f32 1.0, %v242_v5  ;;  %vm246_vm11 = vcmp.lt.f32.partialorder %v245_v22, 0.0004427343 }
 0x134   :  { %v226_v17 = vmul.f32 0.6931472, %v297_v7  ;;  %v204_v30 = vsel %vm203_vm9, %v201_v0, 0.0 }
 0x135   :  { %v244_v26 = vmul.f32 %v295_v57, %v243_v19  ;;  %v205_v37 = vadd.f32 %v204_v30, %v157_v35 }
 0x136   :  { %v232_v23 = vsel %vm231_vm10, %v229_v54, %v226_v17 }
 0x137   :  { %v233_v33 = vadd.f32 %v232_v23, %v219_v28 }
 0x139   :  { %v299_v56 = vpop.eup %298 }
 0x13a   :  { %v241_v25 = vmul.f32 0.6931472, %v299_v56 }
 0x13c   :  { %v247_v31 = vsel %vm246_vm11, %v244_v26, %v241_v25 }
 0x13d   :  { %v248_v34 = vadd.f32 %v247_v31, %v234_v29 }
 0x13f   :  { %v249_v36 = vadd.f32 %v248_v34, %v233_v33 }
 0x141   :  { %v252_v38 = vsel %vm251_vm12, %v249_v36, 0.0 }
 0x142   :  { %v253_v39 = vadd.f32 %v252_v38, %v205_v37 }
 0x144   :  { %255 = vst.msk [vmem:[%s485_s3] sm:$0xff] %vm254_vm13, %v253_v39 }
 0x145   :  { %260 = vsyncpa [#allocation3], 1 }
 0x146   :  { %261 = vsyncpa [#allocation5], 1 }

</bundles_post_ra>
